<compile_context>
chip_gen: v6e
topology: v6e:2x2x1
jax: 0.10.0
libtpu: 0.0.40
codegen_flags: <defaults>
</compile_context>

<pallas_src>
import functools
import math

import jax
import jax.numpy as jnp
from jax.experimental import pallas as pl
from jax.experimental.pallas import tpu as pltpu

_ROW_ALIGN = 16  # sublane alignment safe for both f32 and bf16 output blocks


def _round_up(x, m):
    return ((x + m - 1) // m) * m


def make_positions(input_ids, padding_idx, left_pad):
    """JAX mirror of the PyTorch make_positions (cheap integer preprocessing)."""
    input_ids = input_ids.astype(jnp.int32)
    B, L = input_ids.shape
    mask = input_ids != padding_idx
    positions = jnp.arange(padding_idx + 1, padding_idx + 1 + L, dtype=jnp.int32)
    positions = jnp.broadcast_to(positions[None, :], (B, L))
    if left_pad:
        positions = positions - L + jnp.sum(mask, axis=1, keepdims=True).astype(jnp.int32)
    # pad slots keep their original value, which is padding_idx (mask is False there)
    return jnp.where(mask, positions, input_ids)


# ---------------------------------------------------------------------------
# Kernel bodies
# ---------------------------------------------------------------------------
def _split_kernel(pos_ref, freq_ref, o_ref, *, padding_idx):
    # pos_ref:  (tm, 1)    int32 positions (padding rows hold padding_idx)
    # freq_ref: (1, half)  float32 inverse frequencies
    # o_ref:    (tm, 2*half)
    pos_i = pos_ref[...]
    pos_f = pos_i.astype(jnp.float32)
    ang = pos_f * freq_ref[...]                                    # (tm, half)
    emb = jnp.concatenate([jnp.sin(ang), jnp.cos(ang)], axis=-1)   # exact sin/cos split
    o_ref[...] = jnp.where(pos_i != padding_idx, emb, 0.0).astype(o_ref.dtype)


def _fold_kernel(pos_ref, expand_ref, scale_ref, phase_ref, o_ref, *, padding_idx):
    # pos_ref:    (tm, f)   int32 positions, f = 128 // D rows folded per output row
    # expand_ref: (f, 128)  0/1 indicator, expand[j, l] = (l // D == j)
    # scale_ref:  (1, 128)  [inv_freq | inv_freq] tiled f times
    # phase_ref:  (1, 128)  [0 | pi/2] tiled f times
    # o_ref:      (tm, 128) f lane-packed embedding rows of width D (lane-dense stores)
    pos_i = pos_ref[...]
    pos_f = pos_i.astype(jnp.float32)
    # Expand positions to all 128 lanes with a tiny matmul on the otherwise-idle MXU.
    # HIGHEST precision reproduces integer positions exactly (no bf16 truncation).
    pos_lane = jnp.dot(pos_f, expand_ref[...],
                       preferred_element_type=jnp.float32,
                       precision=jax.lax.Precision.HIGHEST)        # (tm, 128)
    ang = pos_lane * scale_ref[...] + phase_ref[...]               # single FMA per elem
    emb = jnp.sin(ang)                                             # cos lanes via +pi/2
    o_ref[...] = jnp.where(pos_lane != padding_idx, emb, 0.0).astype(o_ref.dtype)


# ---------------------------------------------------------------------------
# Wrapper
# ---------------------------------------------------------------------------
def _pick_tm(requested, n_rows, lane_width, out_itemsize):
    """Largest row tile that keeps double-buffered blocks well under v5e's 16 MiB
    scoped-VMEM default; capped at 1024 so v7x's two TCs get several tiles each."""
    per_row = 2 * (lane_width * out_itemsize + 128 * 4)   # out block + lane-padded pos
    budget = 8 * 1024 * 1024
    tm = min(requested, 1024, max(_ROW_ALIGN, budget // per_row),
             _round_up(n_rows, _ROW_ALIGN))
    return max(_ROW_ALIGN, (tm // _ROW_ALIGN) * _ROW_ALIGN)


def sinusoidal_positional_embedding(input_ids, embedding_dim, padding_idx=0,
                                    left_pad=0, *, tm=1024, out_dtype=jnp.float32):
    """input_ids: (B, L) int tokens -> (B, L, embedding_dim) sinusoidal embeddings."""
    assert embedding_dim > 2, "embedding_dim must be > 2 (fairseq formula uses half_dim-1)"
    B, L = input_ids.shape
    M = B * L
    half = embedding_dim // 2
    d_even = 2 * half                    # odd dims: trailing zero column added in wrapper
    out_itemsize = jnp.dtype(out_dtype).itemsize

    positions = make_positions(input_ids, padding_idx, left_pad).reshape(M)
    inv_freq = jnp.exp(jnp.arange(half, dtype=jnp.float32)
                       * -(math.log(10000.0) / (half - 1)))

    params = pltpu.CompilerParams(dimension_semantics=("parallel",))

    fold = (d_even < 128) and (128 % d_even == 0)
    if fold:
        # ---- lane-folded path: pack f = 128 // d_even rows per 128-lane output row ----
        f = 128 // d_even
        pat_scale = jnp.concatenate([inv_freq, inv_freq])                       # (d_even,)
        pat_phase = jnp.concatenate([jnp.zeros((half,), jnp.float32),
                                     jnp.full((half,), math.pi / 2.0, jnp.float32)])
        scale = jnp.tile(pat_scale, f).reshape(1, 128)
        phase = jnp.tile(pat_phase, f).reshape(1, 128)
        expand = jnp.kron(jnp.eye(f, dtype=jnp.float32),
                          jnp.ones((1, d_even), jnp.float32))                   # (f, 128)

        n_fold = -(-M // f)
        tm_eff = _pick_tm(tm, n_fold, 128, out_itemsize)
        nf_pad = _round_up(n_fold, tm_eff)
        m_pad = nf_pad * f
        pos = jnp.pad(positions, (0, m_pad - M),
                      constant_values=padding_idx).reshape(nf_pad, f)

        kernel = functools.partial(_fold_kernel, padding_idx=padding_idx)
        out = pl.pallas_call(
            kernel,
            out_shape=jax.ShapeDtypeStruct((nf_pad, 128), out_dtype),
            grid_spec=pltpu.PrefetchScalarGridSpec(
                num_scalar_prefetch=0,
                grid=(nf_pad // tm_eff,),
                in_specs=[
                    pl.BlockSpec((tm_eff, f), lambda i: (i, 0)),      # positions
                    pl.BlockSpec((f, 128), lambda i: (0, 0)),         # expand indicator
                    pl.BlockSpec((1, 128), lambda i: (0, 0)),         # scale
                    pl.BlockSpec((1, 128), lambda i: (0, 0)),         # phase
                ],
                out_specs=pl.BlockSpec((tm_eff, 128), lambda i: (i, 0)),
            ),
            compiler_params=params,
            cost_estimate=pl.CostEstimate(
                flops=(2 * f + 4) * nf_pad * 128,
                transcendentals=nf_pad * 128,
                bytes_accessed=4 * nf_pad * f + 4 * (f + 2) * 128
                + out_itemsize * nf_pad * 128,
            ),
        )(pos, expand, scale, phase)
        out = out.reshape(m_pad, d_even)[:M]
    else:
        # ---- split path: one half-width angle, direct sin / cos, lane-dense store ----
        lane_w = _round_up(d_even, 128)
        tm_eff = _pick_tm(tm, M, lane_w, out_itemsize)
        m_pad = _round_up(M, tm_eff)
        pos = jnp.pad(positions, (0, m_pad - M),
                      constant_values=padding_idx).reshape(m_pad, 1)
        freq = inv_freq.reshape(1, half)

        kernel = functools.partial(_split_kernel, padding_idx=padding_idx)
        out = pl.pallas_call(
            kernel,
            out_shape=jax.ShapeDtypeStruct((m_pad, d_even), out_dtype),
            grid_spec=pltpu.PrefetchScalarGridSpec(
                num_scalar_prefetch=0,
                grid=(m_pad // tm_eff,),
                in_specs=[
                    pl.BlockSpec((tm_eff, 1), lambda i: (i, 0)),      # positions
                    pl.BlockSpec((1, half), lambda i: (0, 0)),        # inv_freq
                ],
                out_specs=pl.BlockSpec((tm_eff, d_even), lambda i: (i, 0)),
            ),
            compiler_params=params,
            cost_estimate=pl.CostEstimate(
                flops=4 * m_pad * d_even,
                transcendentals=m_pad * d_even,
                bytes_accessed=4 * m_pad + 4 * half + out_itemsize * m_pad * d_even,
            ),
        )(pos, freq)
        out = out[:M]

    if embedding_dim % 2 == 1:
        out = jnp.concatenate([out, jnp.zeros((M, 1), dtype=out_dtype)], axis=-1)
    return out.reshape(B, L, embedding_dim)


# ---------------- reference (plain JAX, mirrors the PyTorch module exactly) -------------
def _reference(input_ids, embedding_dim, padding_idx, left_pad):
    B, L = input_ids.shape
    max_pos = padding_idx + 1 + L
    half_dim = embedding_dim // 2
    e = math.log(10000.0) / (half_dim - 1)
    freqs = jnp.exp(jnp.arange(half_dim, dtype=jnp.float32) * -e)
    ang = jnp.arange(max_pos, dtype=jnp.float32)[:, None] * freqs[None, :]
    table = jnp.concatenate([jnp.sin(ang), jnp.cos(ang)], axis=1)
    if embedding_dim % 2 == 1:
        table = jnp.concatenate([table, jnp.zeros((max_pos, 1), jnp.float32)], axis=1)
    table = table.at[padding_idx, :].set(0.0)
    positions = make_positions(input_ids, padding_idx, left_pad)
    return table[positions.reshape(-1)].reshape(B, L, embedding_dim)


if __name__ == "__main__":
    key = jax.random.PRNGKey(0)
    k1, k2 = jax.random.split(key)

    # --- 1. D < 128 -> lane-folded path (f=4), right padding, pad-and-slice rows ---
    B, L, D = 2, 8, 32
    pad_idx = 0
    ids = jax.random.randint(k1, (B, L), 1, 100, dtype=jnp.int32)
    ids = ids.at[1, L - 3:].set(pad_idx)
    y = jax.block_until_ready(
        sinusoidal_positional_embedding(ids, D, padding_idx=pad_idx, left_pad=0))
    y_ref = _reference(ids, D, pad_idx, 0)
    assert y.shape == (B, L, D)
    assert bool(jnp.all(y[1, L - 3:, :] == 0.0))                    # padding rows zero
    assert jnp.allclose(y, y_ref, atol=1e-5, rtol=1e-5), float(jnp.max(jnp.abs(y - y_ref)))

    # --- 2. same config, bf16 output (halves HBM writeback / VMEM pressure) ---
    y_bf16 = jax.block_until_ready(
        sinusoidal_positional_embedding(ids, D, padding_idx=pad_idx, left_pad=0,
                                        out_dtype=jnp.bfloat16))
    assert y_bf16.dtype == jnp.bfloat16
    assert jnp.allclose(y_bf16.astype(jnp.float32), y_ref, atol=1e-2, rtol=1e-2)

    # --- 3. D >= 128 -> sin/cos split path, left padding, padding_idx=1 ---
    B2, L2, D2 = 2, 12, 256
    pad_idx2 = 1
    ids2 = jax.random.randint(k2, (B2, L2), 2, 100, dtype=jnp.int32)
    ids2 = ids2.at[0, :4].set(pad_idx2)                             # left-pad sequence 0
    y2 = jax.block_until_ready(
        sinusoidal_positional_embedding(ids2, D2, padding_idx=pad_idx2, left_pad=1))
    y2_ref = _reference(ids2, D2, pad_idx2, 1)
    assert bool(jnp.all(y2[0, :4, :] == 0.0))
    assert jnp.allclose(y2, y2_ref, atol=1e-5, rtol=1e-5), float(jnp.max(jnp.abs(y2 - y2_ref)))

    # --- 4. odd embedding_dim (trailing zero column appended in the wrapper) ---
    D3 = 33
    y3 = jax.block_until_ready(
        sinusoidal_positional_embedding(ids, D3, padding_idx=pad_idx, left_pad=0))
    y3_ref = _reference(ids, D3, pad_idx, 0)
    assert jnp.allclose(y3, y3_ref, atol=1e-5, rtol=1e-5), float(jnp.max(jnp.abs(y3 - y3_ref)))

    print("KERNEL_OK")
</pallas_src>

<mosaic_0001>
module attributes {stable_mosaic.version = 11 : i64} {
  func.func @_fold_kernel(%arg0: i32, %arg1: memref<16x4xi32, #tpu.memory_space<vmem>>, %arg2: memref<4x128xf32, #tpu.memory_space<vmem>>, %arg3: memref<1x128xf32, #tpu.memory_space<vmem>>, %arg4: memref<1x128xf32, #tpu.memory_space<vmem>>, %arg5: memref<16x128xf32, #tpu.memory_space<vmem>>) attributes {dimension_semantics = [#tpu.dimension_semantics<parallel>], iteration_bounds = array<i64: 1>, scalar_prefetch = 0 : i64, scratch_operands = 0 : i64, tpu.core_type = #tpu.core_type<tc>, window_params = [{transform_indices = @transform_0, window_bounds = array<i64: 16, 4>}, {pipeline_mode = #tpu.pipeline_mode<synchronous>, transform_indices = @transform_1, window_bounds = array<i64: 4, 128>}, {pipeline_mode = #tpu.pipeline_mode<synchronous>, transform_indices = @transform_2, window_bounds = array<i64: 1, 128>}, {pipeline_mode = #tpu.pipeline_mode<synchronous>, transform_indices = @transform_3, window_bounds = array<i64: 1, 128>}, {transform_indices = @transform_4, window_bounds = array<i64: 16, 128>}]} {
    %c0 = arith.constant 0 : index
    %c0_0 = arith.constant 0 : index
    %0 = vector.load %arg1[%c0, %c0_0] : memref<16x4xi32, #tpu.memory_space<vmem>>, vector<16x4xi32>
    %1 = arith.sitofp %0 : vector<16x4xi32> to vector<16x4xf32>
    %c0_1 = arith.constant 0 : index
    %c0_2 = arith.constant 0 : index
    %2 = vector.load %arg2[%c0_1, %c0_2] : memref<4x128xf32, #tpu.memory_space<vmem>>, vector<4x128xf32>
    %cst = arith.constant dense<0.000000e+00> : vector<16x128xf32>
    %3 = tpu.matmul %1, %2, %cst {dimension_numbers = #tpu.dot_dimension_numbers<[1], [0], [0], [1], [0, 0, 1, 1], [], []>, precision = #tpu.contract_precision<fp32>} : vector<16x4xf32>, vector<4x128xf32>, vector<16x128xf32> -> vector<16x128xf32>
    %c0_3 = arith.constant 0 : index
    %c0_4 = arith.constant 0 : index
    %4 = vector.load %arg3[%c0_3, %c0_4] : memref<1x128xf32, #tpu.memory_space<vmem>>, vector<1x128xf32>
    %5 = vector.broadcast %4 : vector<1x128xf32> to vector<16x128xf32>
    %6 = arith.mulf %3, %5 : vector<16x128xf32>
    %c0_5 = arith.constant 0 : index
    %c0_6 = arith.constant 0 : index
    %7 = vector.load %arg4[%c0_5, %c0_6] : memref<1x128xf32, #tpu.memory_space<vmem>>, vector<1x128xf32>
    %8 = vector.broadcast %7 : vector<1x128xf32> to vector<16x128xf32>
    %9 = arith.addf %6, %8 : vector<16x128xf32>
    %10 = math.sin %9 : vector<16x128xf32>
    %cst_7 = arith.constant 0.000000e+00 : f32
    %11 = vector.broadcast %cst_7 : f32 to vector<16x128xf32>
    %12 = arith.cmpf one, %3, %11 : vector<16x128xf32>
    %cst_8 = arith.constant 0.000000e+00 : f32
    %13 = vector.broadcast %cst_8 : f32 to vector<16x128xf32>
    %14 = arith.select %12, %10, %13 : vector<16x128xi1>, vector<16x128xf32>
    %c0_9 = arith.constant 0 : index
    %c0_10 = arith.constant 0 : index
    %15 = vector.load %arg5[%c0_9, %c0_10] : memref<16x128xf32, #tpu.memory_space<vmem>>, vector<16x128xf32>
    tpu.vector_store %arg5[%c0_9, %c0_10], %14 {strides = array<i32>} : memref<16x128xf32, #tpu.memory_space<vmem>>, vector<16x128xf32>,
    return
  }
  func.func @transform_0(%arg0: i32) -> (i32, i32) {
    %c0_i32 = arith.constant 0 : i32
    %c0_i32_0 = arith.constant 0 : i32
    return %arg0, %c0_i32 : i32, i32
  }
  func.func @transform_1(%arg0: i32) -> (i32, i32) {
    %c0_i32 = arith.constant 0 : i32
    %c0_i32_0 = arith.constant 0 : i32
    %c0_i32_1 = arith.constant 0 : i32
    return %c0_i32, %c0_i32_0 : i32, i32
  }
  func.func @transform_2(%arg0: i32) -> (i32, i32) {
    %c0_i32 = arith.constant 0 : i32
    %c0_i32_0 = arith.constant 0 : i32
    %c0_i32_1 = arith.constant 0 : i32
    return %c0_i32, %c0_i32_0 : i32, i32
  }
  func.func @transform_3(%arg0: i32) -> (i32, i32) {
    %c0_i32 = arith.constant 0 : i32
    %c0_i32_0 = arith.constant 0 : i32
    %c0_i32_1 = arith.constant 0 : i32
    return %c0_i32, %c0_i32_0 : i32, i32
  }
  func.func @transform_4(%arg0: i32) -> (i32, i32) {
    %c0_i32 = arith.constant 0 : i32
    %c0_i32_0 = arith.constant 0 : i32
    return %arg0, %c0_i32 : i32, i32
  }
}

</mosaic_0001>

<bundles_post_ra>
// kernel: tpu_custom_call.1
= control target key start
LH: loop header
LB: loop body
LE: loop exit
PB: predicated region body
PF: predicated region fallthrough
CT: control target
= control target key end

     0   :  { %vm30_vm0 = vcmask 1043456   ;;  %vm23_vm1 = vcmask 31744   ;;  %s1005_s0 = inlined_call_operand.vmem [shape: s32[16,4], index: 0, kind: input, shape index: {}]   ;;  %s1006_s1 = inlined_call_operand.vmem [shape: f32[4,128], index: 1, kind: input, shape index: {}]   ;;  %s1007_s2 = inlined_call_operand.vmem [shape: f32[1,128], index: 2, kind: input, shape index: {}]   ;;  %s1008_s3 = inlined_call_operand.vmem [shape: f32[1,128], index: 3, kind: input, shape index: {}]   ;;  %s1009_s4 = inlined_call_operand.hbm [shape: f32[16,128], index: 4, kind: output, shape index: {}]  }
   0x1   :  { %v22_v0 = vld [vmem:[%s1006_s1] sm:$0xf]  ;;  %v19_v2 = vld [vmem:[%s1005_s0 + $0x8] sm:$0xff] }
   0x2   :  { %v18_v1 = vld [vmem:[%s1005_s0] sm:$0xff]  ;;  %v32_v3 = vsel %vm30_vm0, %v22_v0, 0  ;;  %v21_v5 = vcvt.s32.f32 %v19_v2 }
   0x3   :  { %v20_v4 = vcvt.s32.f32 %v18_v1 }
   0x4   :  { %9 = vsyncpa [#allocation3], 0  ;;  %v65_v6 = vand.u32 4294901760, %v32_v3  ;;  %v28_v8 = vsel %vm23_vm1, %v21_v5, 0  ;;  %v771_v40 = vld [vmem:[%s1007_s2] ss:$0 sm:$0xff] }
   0x5   :  { %v25_v7 = vsel %vm23_vm1, %v20_v4, 0  ;;  %v110_v11 = vand.u32 4294901760, %v28_v8  ;;  %v772_v44 = vld [vmem:[%s1008_s3] ss:$0 sm:$0xff]  ;;  %v876_v5 = vmov 683565275  }
   0x6   :  { %799 = vmatprep.subr.mxu0 %v65_v6  ;;  %v152_v9 = vsub.f32 %v32_v3, %v65_v6  ;;  %v100_v10 = vand.u32 4294901760, %v25_v7  ;;  %s882_s2 = smov [#allocation2]  }
   0x7   :  { %800 = vmatpush3.msra.mxu0 %v65_v6  ;;  %v111_v14 = vsub.f32 %v28_v8, %v110_v11  ;;  %v877_v8 = vmov 2475754826   ;;  %s760_s3 = sshll.u32 %s882_s2, 4  ;;  %s761_s3 = int_to_ptr.vmem [resolvable:$true] %s760_s3 }
   0x8   :  { %v153_v12 = vand.u32 4294901760, %v152_v9  ;;  %v101_v13 = vsub.f32 %v25_v7, %v100_v10  ;;  %806 = vmatprep.mubr.f32.mxu1 %v100_v10  ;;  %809 = vmatprep.subr.mxu0 %v152_v9  ;;  %s854_s23 = scalar_lea.vmem %s761_s3, 256  ;;  %p859_p1 = scmp.lt.s32.totalorder %s761_s3, %s761_s3 }
   0x9   :  { %v112_v17 = vand.u32 4294901760, %v111_v14  ;;  %p855_p0 = scmp.ne.s32.totalorder %s761_s3, %s854_s23  ;;  %p860_p2 = scmp.lt.s32.totalorder %s854_s23, %s854_s23 }
   0xa   :  { %v154_v15 = vsub.f32 %v152_v9, %v153_v12  ;;  %v102_v16 = vand.u32 4294901760, %v101_v13 }
   0xb   :  { %v113_v20 = vsub.f32 %v111_v14, %v112_v17  ;;  %p861_p3 = por %p860_p2, %p859_p1 }
   0xc   :  { %v155_v18 = vand.u32 4294901760, %v154_v15  ;;  %v103_v19 = vsub.f32 %v101_v13, %v102_v16 }
   0xd   :  { %v114_v22 = vand.u32 4294901760, %v113_v20  ;;  %p862_p4 = pnand %p861_p3, %p855_p0 }
   0xe   :  { %804 = vmatprep.subr.mxu1 %v155_v18  ;;  %v104_v21 = vand.u32 4294901760, %v103_v19 }
   0xf   :  { %805 = vmatpush3.msra.mxu1 %v155_v18 }
  0x10   :  { %801 = vmatprep.mubr.f32.mxu0 %v104_v21  ;;  %807 = vmatmul.mubr.f32.vlgmr.msra.gmra.mxu1 %v110_v11  ;;  %v881_v21 = vmov 1326507024  }
  0x11   :  { %802 = vmatmul.mubr.f32.vlgmr.msra.gmra.mxu0 %v114_v22  ;;  %814 = vmatprep.subr.mxu1 %v65_v6 }
  0x12   :  { %810 = vmatpush3.msra.mxu0 %v152_v9  ;;  %815 = vmatpush3.msra.mxu1 %v65_v6 }
  0x13   :  { %811 = vmatprep.mubr.f32.mxu0 %v101_v13  ;;  %816 = vmatprep.mubr.f32.mxu1 %v102_v16 }
  0x14   :  { %819 = vmatprep.subr.mxu0 %v153_v12  ;;  %817 = vmatmul.mubr.f32.vlgmr.msra.gmra.mxu1 %v112_v17 }
  0x15   :  { %812 = vmatmul.mubr.f32.vlgmr.msra.gmra.mxu0 %v111_v14  ;;  %824 = vmatprep.subr.mxu1 %v65_v6  ;;  %v880_v14 = vmov 920167782  }
  0x16   :  { %820 = vmatpush3.msra.mxu0 %v153_v12  ;;  %825 = vmatpush3.msra.mxu1 %v65_v6  ;;  %v879_v12 = vmov 2102212464  }
  0x17   :  { %821 = vmatprep.mubr.f32.mxu0 %v100_v10  ;;  %826 = vmatprep.mubr.f32.mxu1 %v100_v10  ;;  %v878_v10 = vmov 2131351028  }
  0x18   :  { %827 = vmatmul.mubr.f32.vlgmr.msra.gmra.mxu1 %v110_v11 }
  0x19   :  { %822 = vmatmul.mubr.f32.vlgmr.msra.gmra.mxu0 %v110_v11 }
  0xd0   :  { %v808_v23 = vpop.f32.mrf.mxu1 }
  0xd1   :  { %v803_v24 = vpop.f32.mrf.mxu0 }
  0xd2   :  { %v192_v25 = vpop.f32.mrf.mxu1  ;;  %v199_v27 = vadd.f32 %v808_v23, %v803_v24 }
  0xd3   :  { %v106_v26 = vpop.f32.mrf.mxu0 }
  0xd4   :  { %v818_v28 = vpop.f32.mrf.mxu1  ;;  %v193_v30 = vadd.f32 %v192_v25, %v106_v26 }
  0xd5   :  { %v813_v29 = vpop.f32.mrf.mxu0 }
  0xd6   :  { %v280_v31 = vadd.f32 %v813_v29, %v199_v27  ;;  %v353_v32 = vpop.f32.mrf.mxu1 }
  0xd7   :  { %v272_v33 = vpop.f32.mrf.mxu0 }
  0xd8   :  { %v362_v34 = vadd.f32 %v818_v28, %v280_v31  ;;  %v273_v35 = vadd.f32 %v272_v33, %v193_v30  ;;  %v828_v37 = vpop.f32.mrf.mxu1 }
  0xd9   :  { %v823_v36 = vpop.f32.mrf.mxu0 }
  0xda   :  { %v354_v38 = vadd.f32 %v353_v32, %v273_v35  ;;  %v442_v39 = vadd.f32 %v823_v36, %v362_v34  ;;  %v513_v45 = vpop.f32.mrf.mxu1 }
  0xdb   :  { %v435_v41 = vpop.f32.mrf.mxu0 }
  0xdc   :  { %v922_v42 = vadd.f32 %v828_v37, %v442_v39  ;;  %v436_v43 = vadd.f32 %v435_v41, %v354_v38 }
  0xde   :  { %v531_v46 = vmul.f32 %v771_v40, %v922_v42  ;;  %v928_v47 = vadd.f32 %v513_v45, %v436_v43 }
  0xe0   :  { %v930_v48 = vadd.f32 %v772_v44, %v531_v46  ;;  %v530_v49 = vmul.f32 %v771_v40, %v928_v47 }
  0xe2   :  { %v645_v50 = vand.u32 2147483647, %v930_v48  ;;  %v648_v51 = vand.u32 2139095040, %v930_v48  ;;  %v935_v52 = vadd.f32 %v772_v44, %v530_v49  ;;  %vm647_vm0 = vcmp.lt.s32.totalorder %v930_v48, 0 }
  0xe4   :  { %v649_v53 = vshrl.u32 %v648_v51, 23  ;;  %v652_v54 = vand.u32 8388607, %v645_v50  ;;  %v544_v55 = vand.u32 2139095040, %v935_v52  ;;  %v541_v57 = vand.u32 2147483647, %v935_v52 }
  0xe5   :  { %vm646_vm1 = vcmp.le.f32.partialorder %v645_v50, 0.7853982 }
  0xe6   :  { %v777_v56 = vadd.s32 4294967169, %v649_v53  ;;  %v545_v58 = vshrl.u32 %v544_v55, 23  ;;  %v653_v60 = vor.u32 8388608, %v652_v54  ;;  %v548_v62 = vand.u32 8388607, %v541_v57 }
  0xe8   :  { %v655_v59 = vadd.s32 1, %v777_v56  ;;  %v773_v61 = vadd.s32 4294967169, %v545_v58  ;;  %v943_v3 = vshll.u32 %v653_v60, 8  ;;  %v549_v7 = vor.u32 8388608, %v548_v62 }
  0xea   :  { %vm656_vm2 = vcmp.gt.s32.totalorder %v655_v59, 0  ;;  %v551_v0 = vadd.s32 1, %v773_v61  ;;  %v589_v40 = vshll.u32 %v549_v7, 8 }
  0xeb   :  { %v657_v63 = vsel %vm656_vm2, %v655_v59, 0  ;;  %vm543_vm2 = vcmp.lt.s32.totalorder %v935_v52, 0 }
  0xec   :  { %v658_v1 = vshrl.u32 %v657_v63, 5  ;;  %v659_v2 = vand.u32 31, %v657_v63  ;;  %vm552_vm3 = vcmp.gt.s32.totalorder %v551_v0, 0 }
  0xed   :  { %v553_v26 = vsel %vm552_vm3, %v551_v0, 0  ;;  %vm989_vm3 = vcmp.le.f32.partialorder %v541_v57, 0.7853982 }
  0xee   :  { %v660_v4 = vsub.s32 32, %v659_v2  ;;  %v662_v6 = vshll.u32 %v876_v5, %v659_v2  ;;  %v665_v9 = vshll.u32 %v877_v8, %v659_v2  ;;  %v668_v11 = vshll.u32 %v878_v10, %v659_v2 }
  0xef   :  { %v671_v13 = vshll.u32 %v879_v12, %v659_v2  ;;  %v674_v15 = vshll.u32 %v880_v14, %v659_v2  ;;  %vm677_vm4 = vcmp.lt.s32.totalorder %v658_v1, 1  ;;  %vm679_vm5 = vcmp.lt.s32.totalorder %v658_v1, 3 }
  0xf0   :  { %v663_v16 = vshrl.u32 %v877_v8, %v660_v4  ;;  %v666_v17 = vshrl.u32 %v878_v10, %v660_v4  ;;  %v669_v18 = vshrl.u32 %v879_v12, %v660_v4  ;;  %v661_v19 = vshrl.u32 %v876_v5, %v660_v4 }
  0xf1   :  { %v672_v20 = vshrl.u32 %v880_v14, %v660_v4  ;;  %v675_v22 = vshrl.u32 %v881_v21, %v660_v4  ;;  %vm680_vm6 = vcmp.lt.s32.totalorder %v658_v1, 4  ;;  %v555_v29 = vand.u32 31, %v553_v26 }
  0xf2   :  { %v664_v23 = vor.u32 %v663_v16, %v662_v6  ;;  %v667_v24 = vor.u32 %v666_v17, %v665_v9  ;;  %v670_v25 = vor.u32 %v669_v18, %v668_v11  ;;  %vm678_vm7 = vcmp.lt.s32.totalorder %v658_v1, 2 }
  0xf3   :  { %v673_v27 = vor.u32 %v672_v20, %v671_v13  ;;  %v676_v28 = vor.u32 %v675_v22, %v674_v15  ;;  %v556_v37 = vsub.s32 32, %v555_v29  ;;  %v554_v45 = vshrl.u32 %v553_v26, 5 }
  0xf4   :  { %v681_v30 = vsel %vm677_vm4, %v661_v19, %v664_v23  ;;  %v682_v31 = vsel %vm680_vm6, %v670_v25, 2102212464  ;;  %v685_v32 = vsel %vm677_vm4, %v664_v23, %v667_v24  ;;  %v689_v33 = vsel %vm677_vm4, %v667_v24, %v670_v25 }
  0xf5   :  { %v683_v34 = vsel %vm679_vm5, %v667_v24, %v682_v31  ;;  %v686_v35 = vsel %vm680_vm6, %v673_v27, 920167782  ;;  %v690_v36 = vsel %vm680_vm6, %v676_v28, 1326507024  ;;  %v558_v54 = vshll.u32 %v876_v5, %v555_v29 }
  0xf6   :  { %v687_v38 = vsel %vm679_vm5, %v670_v25, %v686_v35  ;;  %v691_v39 = vsel %vm679_vm5, %v673_v27, %v690_v36  ;;  %v684_v41 = vsel %vm678_vm7, %v681_v30, %v683_v34  ;;  %v559_v55 = vshrl.u32 %v877_v8, %v556_v37 }
  0xf7   :  { %v688_v43 = vsel %vm678_vm7, %v685_v32, %v687_v38  ;;  %v692_v44 = vsel %vm678_vm7, %v689_v33, %v691_v39  ;;  %v561_v56 = vshll.u32 %v877_v8, %v555_v29  ;;  %v562_v58 = vshrl.u32 %v878_v10, %v556_v37 }
  0xf8   :  { %v955_v46 = vmul.u32.u64.low %v943_v3, %v692_v44  ;;  %v956_v49 = vmul.u32.u64.high %v943_v3, %v692_v44, %v955_v46  ;;  %v959_v51 = vmul.u32.u64.low %v943_v3, %v688_v43  ;;  %v960_v53 = vmul.u32.u64.high %v943_v3, %v688_v43, %v959_v51 }
  0xf9   :  { %v564_v59 = vshll.u32 %v878_v10, %v555_v29  ;;  %v565_v60 = vshrl.u32 %v879_v12, %v556_v37  ;;  %v567_v61 = vshll.u32 %v879_v12, %v555_v29  ;;  %v568_v62 = vshrl.u32 %v880_v14, %v556_v37 }
  0xfa   :  { %v560_v63 = vor.u32 %v559_v55, %v558_v54  ;;  %v563_v0 = vor.u32 %v562_v58, %v561_v56  ;;  %v570_v1 = vshll.u32 %v880_v14, %v555_v29  ;;  %v571_v2 = vshrl.u32 %v881_v21, %v556_v37 }
  0xfb   :  { %v700_v4 = vmul.u32 %v943_v3, %v684_v41  ;;  %vm702_vm8 = vc.u32 %v956_v49, %v959_v51  ;;  %v703_v6 = vadd.s32 1, %v960_v53  ;;  %v566_v7 = vor.u32 %v565_v60, %v564_v59 }
  0xfc   :  { %v557_v9 = vshrl.u32 %v876_v5, %v556_v37  ;;  %v569_v8 = vor.u32 %v568_v62, %v567_v61  ;;  %v572_v11 = vor.u32 %v571_v2, %v570_v1  ;;  %vm573_vm9 = vcmp.lt.s32.totalorder %v554_v45, 1 }
  0xfd   :  { %v704_v10 = vsel %vm702_vm8, %v703_v6, %v960_v53  ;;  %vm575_vm10 = vcmp.lt.s32.totalorder %v554_v45, 3  ;;  %vm576_vm11 = vcmp.lt.s32.totalorder %v554_v45, 4  ;;  %v581_v12 = vsel %vm573_vm9, %v560_v63, %v563_v0 }
  0xfe   :  { %v705_v13 = vadd.s32 %v704_v10, %v700_v4  ;;  %v578_v14 = vsel %vm576_vm11, %v566_v7, 2102212464  ;;  %v582_v15 = vsel %vm576_vm11, %v569_v8, 920167782  ;;  %v585_v3 = vsel %vm573_vm9, %v563_v0, %v566_v7 }
  0xff   :  { %vm574_vm12 = vcmp.lt.s32.totalorder %v554_v45, 2  ;;  %v577_v16 = vsel %vm573_vm9, %v557_v9, %v560_v63  ;;  %v583_v17 = vsel %vm575_vm10, %v566_v7, %v582_v15  ;;  %v586_v18 = vsel %vm576_vm11, %v572_v11, 1326507024 }
 0x100   :  { %v706_v19 = vadd.s32 536870912, %v705_v13  ;;  %v579_v20 = vsel %vm575_vm10, %v563_v0, %v578_v14  ;;  %v584_v21 = vsel %vm574_vm12, %v581_v12, %v583_v17  ;;  %v587_v5 = vsel %vm575_vm10, %v569_v8, %v586_v18 }
 0x101   :  { %v588_v22 = vsel %vm574_vm12, %v585_v3, %v587_v5  ;;  %v970_v23 = vmul.u32.u64.low %v589_v40, %v584_v21  ;;  %v971_v24 = vmul.u32.u64.high %v589_v40, %v584_v21, %v970_v23  ;;  %v580_v28 = vsel %vm574_vm12, %v577_v16, %v579_v20 }
 0x102   :  { %v707_v25 = vshrl.u32 %v706_v19, 30  ;;  %v973_v26 = vmul.u32.u64.low %v589_v40, %v588_v22  ;;  %v974_v27 = vmul.u32.u64.high %v589_v40, %v588_v22, %v973_v26  ;;  %v596_v32 = vmul.u32 %v589_v40, %v580_v28 }
 0x103   :  { %v599_v30 = vadd.s32 1, %v971_v24  ;;  %v701_v46 = vadd.s32 %v959_v51, %v956_v49  ;;  %vm737_vm7 = vweird.f32 %v930_v48  ;;  %vm750_vm8 = vcmp.ne.f32.partialorder %v922_v42, 0.0 }
 0x104   :  { %v708_v29 = vshll.u32 %v707_v25, 30  ;;  %vm598_vm13 = vc.u32 %v974_v27, %v970_v23  ;;  %v597_v7 = vadd.s32 %v970_v23, %v974_v27  ;;  %v731_v8 = vsub.s32 4, %v707_v25 }
 0x105   :  { %v600_v33 = vsel %vm598_vm13, %v599_v30, %v971_v24  ;;  %vm633_vm12 = vweird.f32 %v935_v52  ;;  %vm749_vm13 = vcmp.ne.f32.partialorder %v928_v47, 0.0 }
 0x106   :  { %v709_v31 = vsub.s32 %v705_v13, %v708_v29  ;;  %v601_v35 = vadd.s32 %v600_v33, %v596_v32  ;;  %v732_v16 = vsel %vm647_vm0, %v731_v8, %v707_v25 }
 0x107   :  { %v734_v20 = vsel %vm646_vm1, 0, %v732_v16 }
 0x108   :  { %v711_v34 = vsub.s32 0, %v709_v31  ;;  %v602_v37 = vadd.s32 536870912, %v601_v35  ;;  %v738_v5 = vadd.s32 3, %v734_v20 }
 0x10a   :  { %v778_v36 = vmin.u32 %v711_v34, %v709_v31  ;;  %v603_v39 = vshrl.u32 %v602_v37, 30  ;;  %v739_v26 = vand.u32 3, %v738_v5 }
 0x10c   :  { %v713_v38 = vclz %v778_v36  ;;  %v604_v43 = vshll.u32 %v603_v39, 30  ;;  %v627_v23 = vsub.s32 4, %v603_v39  ;;  %vm744_vm4 = vcmp.eq.s32.totalorder %v739_v26, 2 }
 0x10d   :  { %vm741_vm5 = vcmp.eq.s32.totalorder %v739_v26, 0  ;;  %vm740_vm6 = vcmp.lt.s32.totalorder %v739_v26, 2 }
 0x10e   :  { %v779_v41 = vadd.s32 4294967294, %v713_v38  ;;  %v605_v45 = vsub.s32 %v601_v35, %v604_v43  ;;  %v628_v27 = vsel %vm543_vm2, %v627_v23, %v603_v39 }
 0x10f   :  { %v630_v57 = vsel %vm989_vm3, 0, %v628_v27 }
 0x110   :  { %vm780_vm14 = vcmp.lt.s32.totalorder %v779_v41, 0  ;;  %v607_v54 = vsub.s32 0, %v605_v45  ;;  %v634_v35 = vadd.s32 3, %v630_v57 }
 0x111   :  { %v716_v44 = vsel %vm780_vm14, 0, %v779_v41 }
 0x112   :  { %v717_v53 = vsub.s32 32, %v716_v44  ;;  %v721_v40 = vsub.s32 4294967266, %v716_v44  ;;  %v718_v55 = vshll.u32 %v709_v31, %v716_v44  ;;  %v774_v59 = vmin.u32 %v607_v54, %v605_v45 }
 0x113   :  { %v635_v38 = vand.u32 3, %v634_v35 }
 0x114   :  { %v719_v56 = vshrl.u32 %v701_v46, %v717_v53  ;;  %v722_v58 = vadd.s32 127, %v721_v40  ;;  %v609_v62 = vclz %v774_v59 }
 0x115   :  { %vm640_vm9 = vcmp.eq.s32.totalorder %v635_v38, 2  ;;  %vm637_vm10 = vcmp.eq.s32.totalorder %v635_v38, 0  ;;  %vm636_vm11 = vcmp.lt.s32.totalorder %v635_v38, 2 }
 0x116   :  { %v720_v60 = vor.u32 %v719_v56, %v718_v55  ;;  %v723_v61 = vshll.u32 %v722_v58, 23  ;;  %v775_v0 = vadd.s32 4294967294, %v609_v62 }
 0x118   :  { %v724_v63 = vor.u32 4788187, %v723_v61  ;;  %v727_v2 = vcvt.s32.f32 %v720_v60  ;;  %vm776_vm15 = vcmp.lt.s32.totalorder %v775_v0, 0 }
 0x119   :  { %v612_v6 = vsel %vm776_vm15, 0, %v775_v0 }
 0x11a   :  { %v725_v1 = vand.u32 2147483647, %v724_v63  ;;  %v613_v49 = vsub.s32 32, %v612_v6  ;;  %v617_v51 = vsub.s32 4294967266, %v612_v6  ;;  %v614_v11 = vshll.u32 %v605_v45, %v612_v6 }
 0x11c   :  { %v728_v4 = vmul.f32 %v727_v2, %v725_v1  ;;  %v615_v10 = vshrl.u32 %v597_v7, %v613_v49  ;;  %v618_v12 = vadd.s32 127, %v617_v51 }
 0x11e   :  { %v729_v9 = vxor.u32 2147483648, %v728_v4  ;;  %v616_v15 = vor.u32 %v615_v10, %v614_v11  ;;  %v619_v3 = vshll.u32 %v618_v12, 23 }
 0x120   :  { %v730_v13 = vsel %vm647_vm0, %v729_v9, %v728_v4  ;;  %v620_v17 = vor.u32 4788187, %v619_v3  ;;  %v623_v19 = vcvt.s32.f32 %v616_v15 }
 0x121   :  { %v733_v14 = vsel %vm646_vm1, %v930_v48, %v730_v13 }
 0x122   :  { %846 = vcosq.f32 %v733_v14  ;;  %v621_v18 = vand.u32 2147483647, %v620_v17 }
 0x123   :  { %848 = vsinq.f32 %v733_v14 }
 0x124   :  { %v624_v21 = vmul.f32 %v623_v19, %v621_v18 }
 0x126   :  { %v625_v22 = vxor.u32 2147483648, %v624_v21 }
 0x128   :  { %v626_v24 = vsel %vm543_vm2, %v625_v22, %v624_v21 }
 0x129   :  { %v629_v25 = vsel %vm989_vm3, %v935_v52, %v626_v24 }
 0x12a   :  { %850 = vcosq.f32 %v629_v25 }
 0x12b   :  { %852 = vsinq.f32 %v629_v25 }
 0x12f   :  { %v847_v28 = vpop.eup %846 }
 0x130   :  { %v849_v29 = vpop.eup %848  ;;  %v745_v30 = vxor.u32 2147483648, %v847_v28 }
 0x131   :  { %v742_v31 = vxor.u32 2147483648, %v849_v29 }
 0x132   :  { %v746_v32 = vsel %vm744_vm4, %v745_v30, %v849_v29 }
 0x133   :  { %v743_v33 = vsel %vm741_vm5, %v847_v28, %v742_v31 }
 0x134   :  { %v747_v34 = vsel %vm740_vm6, %v743_v33, %v746_v32 }
 0x135   :  { %v748_v36 = vsel %vm737_vm7, nan, %v747_v34 }
 0x136   :  { %v752_v37 = vsel %vm750_vm8, %v748_v36, 0.0 }
 0x137   :  { %754 = vst [vmem:[#allocation2 + $0x8] sm:$0xff] %v752_v37  ;;  %v851_v39 = vpop.eup %850 }
 0x138   :  { %v853_v41 = vpop.eup %852  ;;  %v641_v43 = vxor.u32 2147483648, %v851_v39 }
 0x139   :  { %v638_v44 = vxor.u32 2147483648, %v853_v41 }
 0x13a   :  { %v642_v45 = vsel %vm640_vm9, %v641_v43, %v853_v41 }
 0x13b   :  { %v639_v46 = vsel %vm637_vm10, %v851_v39, %v638_v44 }
 0x13c   :  { %v643_v48 = vsel %vm636_vm11, %v639_v46, %v642_v45 }
 0x13d   :  { %v644_v53 = vsel %vm633_vm12, nan, %v643_v48 }
 0x13e   :  { %v751_v42 = vsel %vm749_vm13, %v644_v53, 0.0 }
 0x13f   :  { %753 = vst [vmem:[#allocation2] sm:$0xff] %v751_v42 }
 0x140   :  { %865 = shalt.err (!%p862_p4)
}
 0x141   :  { %s883_s24 = smov 128   ;;  %s884_s25 = smov 8  }
 0x142   :  { %766 = dma.vmem_to_hbm [thread:$0]  %s761_s3, 256, %s1009_s4, [#allocation3], %s883_s24, %s883_s24, %s884_s25  }
 0x143   :  { %874 = dma.done.wait [#allocation3], 256  }
 0x144   :  { %875 = vsyncadd [#allocation3], 4294967040 }
 0x145   :  { %770 = vsyncpa [#allocation3], 1 }

</bundles_post_ra>
